<compile_context>
chip_gen: v7x
topology: tpu7x:2x2x1
jax: 0.10.0
libtpu: 0.0.40
codegen_flags: <defaults>
</compile_context>

<pallas_src>
import functools

import jax
import jax.numpy as jnp
from jax.experimental import pallas as pl
from jax.experimental.pallas import tpu as pltpu

EPS = 1e-5
C = 3  # channel count fixed by the module


# ---------------------------------------------------------------------------
# Single-pass kernel: x fully resident in VMEM (small inputs).
# ---------------------------------------------------------------------------
def _resident_kernel(inv_m, w_ref, b_ref, g_ref, be_ref, x_ref, o_ref):
    """out = relu(batchnorm(conv1x1(x)) - 0.5), everything done in one kernel."""
    x0 = x_ref[:, 0]  # (N, R, L) dense slabs per input channel
    x1 = x_ref[:, 1]
    x2 = x_ref[:, 2]
    for c in range(C):  # static unroll over the 3 output channels
        y = w_ref[c, 0] * x0 + w_ref[c, 1] * x1 + w_ref[c, 2] * x2 + b_ref[c]
        s = jnp.sum(y, axis=(0, 1, 2), keepdims=True)          # (1,1,1)
        ss = jnp.sum(y * y, axis=(0, 1, 2), keepdims=True)     # (1,1,1)
        mean = s * inv_m
        var = jnp.maximum(ss * inv_m - mean * mean, 0.0)       # biased variance
        inv_std = jax.lax.rsqrt(var + EPS)                     # EUP, vector form
        scale = g_ref[c] * inv_std                             # (1,1,1)
        shift = be_ref[c] - mean * scale - 0.5                 # (1,1,1)
        o_ref[:, c] = jnp.maximum(y * scale + shift, 0.0)


# ---------------------------------------------------------------------------
# Two-pass kernels (large inputs).
# ---------------------------------------------------------------------------
def _stats_kernel(w_ref, b_ref, x_ref, stat_ref, acc_ref):
    """Pass 1: per-(sublane,lane) partial sum / sumsq of y = conv1(x)."""
    t = pl.program_id(2)

    @pl.when(t == 0)
    def _():
        acc_ref[...] = jnp.zeros_like(acc_ref)

    x0 = x_ref[0]  # (rt, L) dense slabs
    x1 = x_ref[1]
    x2 = x_ref[2]
    for c in range(C):
        y = w_ref[c, 0] * x0 + w_ref[c, 1] * x1 + w_ref[c, 2] * x2 + b_ref[c]
        acc_ref[c] += y
        acc_ref[C + c] += y * y

    @pl.when(t == pl.num_programs(2) - 1)
    def _():
        # One sublane reduction per chunk, then a single lane-dense store.
        stat_ref[...] = jnp.sum(acc_ref[...], axis=1)  # (2C, L)


def _apply_kernel(w_ref, s_ref, x_ref, o_ref):
    """Pass 2: out = relu(conv1x1(x; w*scale) + shift); BN/bias/-0.5 prefolded."""
    x0 = x_ref[0]
    x1 = x_ref[1]
    x2 = x_ref[2]
    for c in range(C):
        y = w_ref[c, 0] * x0 + w_ref[c, 1] * x1 + w_ref[c, 2] * x2 + s_ref[c]
        o_ref[c] = jnp.maximum(y, 0.0)  # full unmasked (rt, L) store


# ---------------------------------------------------------------------------
# Tiling helpers / wrapper.
# ---------------------------------------------------------------------------
def _pick_rt(rows):
    """Largest multiple-of-8 divisor of `rows` <= 512 giving >= 4 tile steps."""
    if rows <= 8:
        return rows
    cap = min(512, rows // 4)          # aim for >= 4 steps of 192-768 KiB blocks
    cap = max(8, cap - cap % 8)
    for rt in range(cap, 7, -8):
        if rows % rt == 0:
            return rt
    # TODO(synk): rows with no multiple-of-8 divisor <= 512 fall back to a single
    # (possibly large) block per batch element; could VMEM-OOM for huge odd HW.
    return rows


def fused_conv_bn_relu(x_nchw, w_oi, bias, gamma, beta, *,
                       resident_max_bytes=2 * 1024 * 1024):
    """x_nchw: (N, 3, H, W) f32.  Returns relu(batchnorm(conv1x1(x)) - 0.5)."""
    n, c, h, wd = x_nchw.shape
    assert c == C
    hw = h * wd

    x_nchw = x_nchw.astype(jnp.float32)
    w_oi = w_oi.astype(jnp.float32)
    bias = bias.astype(jnp.float32)
    gamma = gamma.astype(jnp.float32)
    beta = beta.astype(jnp.float32)

    # Lane-dense free view of the contiguous H*W axis.
    lanes = 128 if hw % 128 == 0 else hw
    rows = hw // lanes
    x4 = x_nchw.reshape(n, C, rows, lanes)

    smem = pl.BlockSpec(memory_space=pltpu.SMEM)
    x_bytes = n * C * hw * 4

    # ---- small inputs: single fused call, x resident in VMEM ------------------
    # (conservative threshold so input+output blocks + temporaries fit the scoped
    #  VMEM default on every generation, incl. v7x's 64 MiB physical / v5e's
    #  16 MiB default scoped limit)
    if x_bytes <= resident_max_bytes:
        full = pl.BlockSpec((n, C, rows, lanes), lambda i: (0, 0, 0, 0))
        out4 = pl.pallas_call(
            functools.partial(_resident_kernel, 1.0 / float(n * hw)),
            grid=(1,),
            in_specs=[smem, smem, smem, smem, full],
            out_specs=full,
            out_shape=jax.ShapeDtypeStruct((n, C, rows, lanes), jnp.float32),
            compiler_params=pltpu.CompilerParams(
                dimension_semantics=("arbitrary",),
                vmem_limit_bytes=32 * 1024 * 1024),
        )(w_oi, bias, gamma, beta, x4)
        return out4.reshape(n, C, h, wd)

    # ---- large inputs: two-pass training-mode BN ------------------------------
    rt = _pick_rt(rows)
    steps = rows // rt
    # Give pass 1 a "parallel" sub-axis so both v7x TensorCores run when n == 1.
    p = 2 if (n == 1 and steps >= 2 and steps % 2 == 0) else 1
    t_steps = steps // p

    x_spec1 = pl.BlockSpec((None, C, rt, lanes),
                           lambda i, j, t: (i, 0, j * t_steps + t, 0))
    stat_spec = pl.BlockSpec((None, None, 2 * C, lanes),
                             lambda i, j, t: (i, j, 0, 0))

    stats = pl.pallas_call(
        _stats_kernel,
        grid=(n, p, t_steps),
        in_specs=[smem, smem, x_spec1],
        out_specs=stat_spec,
        out_shape=jax.ShapeDtypeStruct((n, p, 2 * C, lanes), jnp.float32),
        scratch_shapes=[pltpu.VMEM((2 * C, rt, lanes), jnp.float32)],
        compiler_params=pltpu.CompilerParams(
            dimension_semantics=("parallel", "parallel", "arbitrary")),
    )(w_oi, bias, x4)

    # Fold BN (training-mode, biased var) + conv bias + (-0.5) per channel.
    tot = jnp.sum(stats, axis=(0, 1, 3))           # (2C,)
    m = jnp.float32(n * hw)
    mean = tot[:C] / m
    var = jnp.maximum(tot[C:] / m - mean * mean, 0.0)
    scale = gamma * jax.lax.rsqrt(var + EPS)
    w_fused = w_oi * scale[:, None]                # scale folded into conv weight
    shift = (bias - mean) * scale + beta - 0.5     # (3,)

    x_spec2 = pl.BlockSpec((None, C, rt, lanes), lambda i, t: (i, 0, t, 0))
    out4 = pl.pallas_call(
        _apply_kernel,
        grid=(n, steps),
        in_specs=[smem, smem, x_spec2],
        out_specs=x_spec2,
        out_shape=jax.ShapeDtypeStruct((n, C, rows, lanes), jnp.float32),
        compiler_params=pltpu.CompilerParams(
            dimension_semantics=("parallel", "parallel")),
    )(w_fused, shift, x4)

    return out4.reshape(n, C, h, wd)


# ---------------------------------------------------------------------------
# Reference + tests.
# ---------------------------------------------------------------------------
def _reference(x, w, b, gamma, beta):
    y = jnp.einsum("oc,nchw->nohw", w, x,
                   precision=jax.lax.Precision.HIGHEST) + b[None, :, None, None]
    mean = jnp.mean(y, axis=(0, 2, 3), keepdims=True)
    var = jnp.mean((y - mean) ** 2, axis=(0, 2, 3), keepdims=True)
    z = (y - mean) * jax.lax.rsqrt(var + EPS)
    z = z * gamma[None, :, None, None] + beta[None, :, None, None]
    return jnp.maximum(z - 0.5, 0.0)


if __name__ == "__main__":
    key = jax.random.PRNGKey(0)
    k1, k2, k3, k4, k5, k6, k7 = jax.random.split(key, 7)

    # Conv2d(3, 3, 1) init: weight (3,3,1,1) -> (3,3), bias (3,)
    bound = 1.0 / (3.0 ** 0.5)
    w_conv = jax.random.uniform(k1, (C, C), jnp.float32, -bound, bound)
    b_conv = jax.random.uniform(k2, (C,), jnp.float32, -bound, bound)

    fused = jax.jit(fused_conv_bn_relu, static_argnames=("resident_max_bytes",))

    # Test 1: the module's exact shape (1, 3, 64, 64) -> resident single-pass.
    x1 = jax.random.normal(k3, (1, C, 64, 64), jnp.float32)
    gamma1 = jnp.ones((C,), jnp.float32)   # BatchNorm3d default affine init
    beta1 = jnp.zeros((C,), jnp.float32)
    out1 = jax.block_until_ready(fused(x1, w_conv, b_conv, gamma1, beta1))
    assert out1.shape == x1.shape
    assert jnp.allclose(out1, _reference(x1, w_conv, b_conv, gamma1, beta1),
                        atol=1e-4, rtol=1e-4)

    # Test 2: multi-batch, forced two-pass path (grid (2,1,4) / (2,4)).
    x2 = jax.random.normal(k4, (2, C, 64, 64), jnp.float32)
    gamma2 = jax.random.uniform(k5, (C,), jnp.float32, 0.5, 1.5)
    beta2 = jax.random.normal(k6, (C,), jnp.float32)
    out2 = jax.block_until_ready(
        fused(x2, w_conv, b_conv, gamma2, beta2, resident_max_bytes=0))
    assert jnp.allclose(out2, _reference(x2, w_conv, b_conv, gamma2, beta2),
                        atol=1e-4, rtol=1e-4)

    # Test 3: n=1, forced two-pass -> exercises the parallel split (p=2) in pass 1.
    x3 = jax.random.normal(k7, (1, C, 128, 128), jnp.float32)
    out3 = jax.block_until_ready(
        fused(x3, w_conv, b_conv, gamma2, beta2, resident_max_bytes=0))
    assert jnp.allclose(out3, _reference(x3, w_conv, b_conv, gamma2, beta2),
                        atol=1e-4, rtol=1e-4)

    # Test 4: HW not a multiple of 128 -> (1, HW) lane fallback, both paths.
    x4 = jax.random.normal(k3, (1, C, 24, 20), jnp.float32)
    out4a = jax.block_until_ready(fused(x4, w_conv, b_conv, gamma2, beta2))
    out4b = jax.block_until_ready(
        fused(x4, w_conv, b_conv, gamma2, beta2, resident_max_bytes=0))
    ref4 = _reference(x4, w_conv, b_conv, gamma2, beta2)
    assert jnp.allclose(out4a, ref4, atol=1e-4, rtol=1e-4)
    assert jnp.allclose(out4b, ref4, atol=1e-4, rtol=1e-4)

    print("KERNEL_OK")
</pallas_src>

<mosaic_0001>
module attributes {stable_mosaic.version = 11 : i64} {
  func.func @_resident_kernel(%arg0: i32, %arg1: memref<3x3xf32, #tpu.memory_space<smem>>, %arg2: memref<3xf32, #tpu.memory_space<smem>>, %arg3: memref<3xf32, #tpu.memory_space<smem>>, %arg4: memref<3xf32, #tpu.memory_space<smem>>, %arg5: memref<1x3x32x128xf32, #tpu.memory_space<vmem>>, %arg6: memref<1x3x32x128xf32, #tpu.memory_space<vmem>>) attributes {dimension_semantics = [#tpu.dimension_semantics<arbitrary>], iteration_bounds = array<i64: 1>, scalar_prefetch = 0 : i64, scratch_operands = 0 : i64, tpu.core_type = #tpu.core_type<tc>, window_params = [{transform_indices = @transform_0, window_bounds = array<i64: 3, 3>}, {transform_indices = @transform_1, window_bounds = array<i64: 3>}, {transform_indices = @transform_2, window_bounds = array<i64: 3>}, {transform_indices = @transform_3, window_bounds = array<i64: 3>}, {pipeline_mode = #tpu.pipeline_mode<synchronous>, transform_indices = @transform_4, window_bounds = array<i64: 1, 3, 32, 128>}, {pipeline_mode = #tpu.pipeline_mode<synchronous>, transform_indices = @transform_5, window_bounds = array<i64: 1, 3, 32, 128>}]} {
    %c0 = arith.constant 0 : index
    %c0_0 = arith.constant 0 : index
    %c0_1 = arith.constant 0 : index
    %c0_2 = arith.constant 0 : index
    %0 = vector.load %arg5[%c0, %c0_0, %c0_1, %c0_2] : memref<1x3x32x128xf32, #tpu.memory_space<vmem>>, vector<1x1x32x128xf32>
    %1 = vector.shape_cast %0 : vector<1x1x32x128xf32> to vector<1x32x128xf32>
    %c0_3 = arith.constant 0 : index
    %c1 = arith.constant 1 : index
    %c0_4 = arith.constant 0 : index
    %c0_5 = arith.constant 0 : index
    %2 = vector.load %arg5[%c0_3, %c1, %c0_4, %c0_5] : memref<1x3x32x128xf32, #tpu.memory_space<vmem>>, vector<1x1x32x128xf32>
    %3 = vector.shape_cast %2 : vector<1x1x32x128xf32> to vector<1x32x128xf32>
    %c0_6 = arith.constant 0 : index
    %c2 = arith.constant 2 : index
    %c0_7 = arith.constant 0 : index
    %c0_8 = arith.constant 0 : index
    %4 = vector.load %arg5[%c0_6, %c2, %c0_7, %c0_8] : memref<1x3x32x128xf32, #tpu.memory_space<vmem>>, vector<1x1x32x128xf32>
    %5 = vector.shape_cast %4 : vector<1x1x32x128xf32> to vector<1x32x128xf32>
    %c0_9 = arith.constant 0 : index
    %c0_10 = arith.constant 0 : index
    %6 = memref.load %arg1[%c0_9, %c0_10] : memref<3x3xf32, #tpu.memory_space<smem>>
    %7 = vector.broadcast %6 : f32 to vector<1x32x128xf32>
    %8 = arith.mulf %7, %1 : vector<1x32x128xf32>
    %c0_11 = arith.constant 0 : index
    %c1_12 = arith.constant 1 : index
    %9 = memref.load %arg1[%c0_11, %c1_12] : memref<3x3xf32, #tpu.memory_space<smem>>
    %10 = vector.broadcast %9 : f32 to vector<1x32x128xf32>
    %11 = arith.mulf %10, %3 : vector<1x32x128xf32>
    %12 = arith.addf %8, %11 : vector<1x32x128xf32>
    %c0_13 = arith.constant 0 : index
    %c2_14 = arith.constant 2 : index
    %13 = memref.load %arg1[%c0_13, %c2_14] : memref<3x3xf32, #tpu.memory_space<smem>>
    %14 = vector.broadcast %13 : f32 to vector<1x32x128xf32>
    %15 = arith.mulf %14, %5 : vector<1x32x128xf32>
    %16 = arith.addf %12, %15 : vector<1x32x128xf32>
    %c0_15 = arith.constant 0 : index
    %17 = memref.load %arg2[%c0_15] : memref<3xf32, #tpu.memory_space<smem>>
    %18 = vector.broadcast %17 : f32 to vector<1x32x128xf32>
    %19 = arith.addf %16, %18 : vector<1x32x128xf32>
    %20 = vector.shape_cast %19 : vector<1x32x128xf32> to vector<1x1x32x128xf32>
    %cst = arith.constant dense<0.000000e+00> : vector<1xf32>
    %21 = vector.multi_reduction <add>, %20, %cst [1, 2, 3] : vector<1x1x32x128xf32> to vector<1xf32>
    %22 = vector.shape_cast %21 : vector<1xf32> to vector<1x1x1x1xf32>
    %23 = vector.extract %22[0, 0, 0, 0] : f32 from vector<1x1x1x1xf32>
    %24 = vector.broadcast %23 : f32 to vector<1x1x1xf32>
    %25 = arith.mulf %19, %19 : vector<1x32x128xf32>
    %26 = vector.shape_cast %25 : vector<1x32x128xf32> to vector<1x1x32x128xf32>
    %cst_16 = arith.constant dense<0.000000e+00> : vector<1xf32>
    %27 = vector.multi_reduction <add>, %26, %cst_16 [1, 2, 3] : vector<1x1x32x128xf32> to vector<1xf32>
    %28 = vector.shape_cast %27 : vector<1xf32> to vector<1x1x1x1xf32>
    %29 = vector.extract %28[0, 0, 0, 0] : f32 from vector<1x1x1x1xf32>
    %30 = vector.broadcast %29 : f32 to vector<1x1x1xf32>
    %cst_17 = arith.constant 2.44140625E-4 : f32
    %31 = vector.broadcast %cst_17 : f32 to vector<1x1x1xf32>
    %32 = arith.mulf %24, %31 : vector<1x1x1xf32>
    %cst_18 = arith.constant 2.44140625E-4 : f32
    %33 = vector.broadcast %cst_18 : f32 to vector<1x1x1xf32>
    %34 = arith.mulf %30, %33 : vector<1x1x1xf32>
    %35 = arith.mulf %32, %32 : vector<1x1x1xf32>
    %36 = arith.subf %34, %35 : vector<1x1x1xf32>
    %cst_19 = arith.constant 0.000000e+00 : f32
    %37 = vector.broadcast %cst_19 : f32 to vector<1x1x1xf32>
    %38 = arith.maximumf %36, %37 : vector<1x1x1xf32>
    %cst_20 = arith.constant 9.99999974E-6 : f32
    %39 = vector.broadcast %cst_20 : f32 to vector<1x1x1xf32>
    %40 = arith.addf %38, %39 : vector<1x1x1xf32>
    %41 = math.rsqrt %40 : vector<1x1x1xf32>
    %c0_21 = arith.constant 0 : index
    %42 = memref.load %arg3[%c0_21] : memref<3xf32, #tpu.memory_space<smem>>
    %43 = vector.broadcast %42 : f32 to vector<1x1x1xf32>
    %44 = arith.mulf %43, %41 : vector<1x1x1xf32>
    %c0_22 = arith.constant 0 : index
    %45 = memref.load %arg4[%c0_22] : memref<3xf32, #tpu.memory_space<smem>>
    %46 = arith.mulf %32, %44 : vector<1x1x1xf32>
    %47 = vector.broadcast %45 : f32 to vector<1x1x1xf32>
    %48 = arith.subf %47, %46 : vector<1x1x1xf32>
    %cst_23 = arith.constant 5.000000e-01 : f32
    %49 = vector.broadcast %cst_23 : f32 to vector<1x1x1xf32>
    %50 = arith.subf %48, %49 : vector<1x1x1xf32>
    %51 = vector.broadcast %44 : vector<1x1x1xf32> to vector<1x32x128xf32>
    %52 = arith.mulf %19, %51 : vector<1x32x128xf32>
    %53 = vector.broadcast %50 : vector<1x1x1xf32> to vector<1x32x128xf32>
    %54 = arith.addf %52, %53 : vector<1x32x128xf32>
    %cst_24 = arith.constant 0.000000e+00 : f32
    %55 = vector.broadcast %cst_24 : f32 to vector<1x32x128xf32>
    %56 = arith.maximumf %54, %55 : vector<1x32x128xf32>
    %c0_25 = arith.constant 0 : index
    %c0_26 = arith.constant 0 : index
    %c0_27 = arith.constant 0 : index
    %c0_28 = arith.constant 0 : index
    %57 = vector.load %arg6[%c0_25, %c0_26, %c0_27, %c0_28] : memref<1x3x32x128xf32, #tpu.memory_space<vmem>>, vector<1x1x32x128xf32>
    %58 = vector.shape_cast %57 : vector<1x1x32x128xf32> to vector<1x32x128xf32>
    %59 = vector.shape_cast %56 : vector<1x32x128xf32> to vector<1x1x32x128xf32>
    tpu.vector_store %arg6[%c0_25, %c0_26, %c0_27, %c0_28], %59 {strides = array<i32>} : memref<1x3x32x128xf32, #tpu.memory_space<vmem>>, vector<1x1x32x128xf32>,
    %c1_29 = arith.constant 1 : index
    %c0_30 = arith.constant 0 : index
    %60 = memref.load %arg1[%c1_29, %c0_30] : memref<3x3xf32, #tpu.memory_space<smem>>
    %61 = vector.broadcast %60 : f32 to vector<1x32x128xf32>
    %62 = arith.mulf %61, %1 : vector<1x32x128xf32>
    %c1_31 = arith.constant 1 : index
    %c1_32 = arith.constant 1 : index
    %63 = memref.load %arg1[%c1_31, %c1_32] : memref<3x3xf32, #tpu.memory_space<smem>>
    %64 = vector.broadcast %63 : f32 to vector<1x32x128xf32>
    %65 = arith.mulf %64, %3 : vector<1x32x128xf32>
    %66 = arith.addf %62, %65 : vector<1x32x128xf32>
    %c1_33 = arith.constant 1 : index
    %c2_34 = arith.constant 2 : index
    %67 = memref.load %arg1[%c1_33, %c2_34] : memref<3x3xf32, #tpu.memory_space<smem>>
    %68 = vector.broadcast %67 : f32 to vector<1x32x128xf32>
    %69 = arith.mulf %68, %5 : vector<1x32x128xf32>
    %70 = arith.addf %66, %69 : vector<1x32x128xf32>
    %c1_35 = arith.constant 1 : index
    %71 = memref.load %arg2[%c1_35] : memref<3xf32, #tpu.memory_space<smem>>
    %72 = vector.broadcast %71 : f32 to vector<1x32x128xf32>
    %73 = arith.addf %70, %72 : vector<1x32x128xf32>
    %74 = vector.shape_cast %73 : vector<1x32x128xf32> to vector<1x1x32x128xf32>
    %cst_36 = arith.constant dense<0.000000e+00> : vector<1xf32>
    %75 = vector.multi_reduction <add>, %74, %cst_36 [1, 2, 3] : vector<1x1x32x128xf32> to vector<1xf32>
    %76 = vector.shape_cast %75 : vector<1xf32> to vector<1x1x1x1xf32>
    %77 = vector.extract %76[0, 0, 0, 0] : f32 from vector<1x1x1x1xf32>
    %78 = vector.broadcast %77 : f32 to vector<1x1x1xf32>
    %79 = arith.mulf %73, %73 : vector<1x32x128xf32>
    %80 = vector.shape_cast %79 : vector<1x32x128xf32> to vector<1x1x32x128xf32>
    %cst_37 = arith.constant dense<0.000000e+00> : vector<1xf32>
    %81 = vector.multi_reduction <add>, %80, %cst_37 [1, 2, 3] : vector<1x1x32x128xf32> to vector<1xf32>
    %82 = vector.shape_cast %81 : vector<1xf32> to vector<1x1x1x1xf32>
    %83 = vector.extract %82[0, 0, 0, 0] : f32 from vector<1x1x1x1xf32>
    %84 = vector.broadcast %83 : f32 to vector<1x1x1xf32>
    %cst_38 = arith.constant 2.44140625E-4 : f32
    %85 = vector.broadcast %cst_38 : f32 to vector<1x1x1xf32>
    %86 = arith.mulf %78, %85 : vector<1x1x1xf32>
    %cst_39 = arith.constant 2.44140625E-4 : f32
    %87 = vector.broadcast %cst_39 : f32 to vector<1x1x1xf32>
    %88 = arith.mulf %84, %87 : vector<1x1x1xf32>
    %89 = arith.mulf %86, %86 : vector<1x1x1xf32>
    %90 = arith.subf %88, %89 : vector<1x1x1xf32>
    %cst_40 = arith.constant 0.000000e+00 : f32
    %91 = vector.broadcast %cst_40 : f32 to vector<1x1x1xf32>
    %92 = arith.maximumf %90, %91 : vector<1x1x1xf32>
    %cst_41 = arith.constant 9.99999974E-6 : f32
    %93 = vector.broadcast %cst_41 : f32 to vector<1x1x1xf32>
    %94 = arith.addf %92, %93 : vector<1x1x1xf32>
    %95 = math.rsqrt %94 : vector<1x1x1xf32>
    %c1_42 = arith.constant 1 : index
    %96 = memref.load %arg3[%c1_42] : memref<3xf32, #tpu.memory_space<smem>>
    %97 = vector.broadcast %96 : f32 to vector<1x1x1xf32>
    %98 = arith.mulf %97, %95 : vector<1x1x1xf32>
    %c1_43 = arith.constant 1 : index
    %99 = memref.load %arg4[%c1_43] : memref<3xf32, #tpu.memory_space<smem>>
    %100 = arith.mulf %86, %98 : vector<1x1x1xf32>
    %101 = vector.broadcast %99 : f32 to vector<1x1x1xf32>
    %102 = arith.subf %101, %100 : vector<1x1x1xf32>
    %cst_44 = arith.constant 5.000000e-01 : f32
    %103 = vector.broadcast %cst_44 : f32 to vector<1x1x1xf32>
    %104 = arith.subf %102, %103 : vector<1x1x1xf32>
    %105 = vector.broadcast %98 : vector<1x1x1xf32> to vector<1x32x128xf32>
    %106 = arith.mulf %73, %105 : vector<1x32x128xf32>
    %107 = vector.broadcast %104 : vector<1x1x1xf32> to vector<1x32x128xf32>
    %108 = arith.addf %106, %107 : vector<1x32x128xf32>
    %cst_45 = arith.constant 0.000000e+00 : f32
    %109 = vector.broadcast %cst_45 : f32 to vector<1x32x128xf32>
    %110 = arith.maximumf %108, %109 : vector<1x32x128xf32>
    %c0_46 = arith.constant 0 : index
    %c1_47 = arith.constant 1 : index
    %c0_48 = arith.constant 0 : index
    %c0_49 = arith.constant 0 : index
    %111 = vector.load %arg6[%c0_46, %c1_47, %c0_48, %c0_49] : memref<1x3x32x128xf32, #tpu.memory_space<vmem>>, vector<1x1x32x128xf32>
    %112 = vector.shape_cast %111 : vector<1x1x32x128xf32> to vector<1x32x128xf32>
    %113 = vector.shape_cast %110 : vector<1x32x128xf32> to vector<1x1x32x128xf32>
    tpu.vector_store %arg6[%c0_46, %c1_47, %c0_48, %c0_49], %113 {strides = array<i32>} : memref<1x3x32x128xf32, #tpu.memory_space<vmem>>, vector<1x1x32x128xf32>,
    %c2_50 = arith.constant 2 : index
    %c0_51 = arith.constant 0 : index
    %114 = memref.load %arg1[%c2_50, %c0_51] : memref<3x3xf32, #tpu.memory_space<smem>>
    %115 = vector.broadcast %114 : f32 to vector<1x32x128xf32>
    %116 = arith.mulf %115, %1 : vector<1x32x128xf32>
    %c2_52 = arith.constant 2 : index
    %c1_53 = arith.constant 1 : index
    %117 = memref.load %arg1[%c2_52, %c1_53] : memref<3x3xf32, #tpu.memory_space<smem>>
    %118 = vector.broadcast %117 : f32 to vector<1x32x128xf32>
    %119 = arith.mulf %118, %3 : vector<1x32x128xf32>
    %120 = arith.addf %116, %119 : vector<1x32x128xf32>
    %c2_54 = arith.constant 2 : index
    %c2_55 = arith.constant 2 : index
    %121 = memref.load %arg1[%c2_54, %c2_55] : memref<3x3xf32, #tpu.memory_space<smem>>
    %122 = vector.broadcast %121 : f32 to vector<1x32x128xf32>
    %123 = arith.mulf %122, %5 : vector<1x32x128xf32>
    %124 = arith.addf %120, %123 : vector<1x32x128xf32>
    %c2_56 = arith.constant 2 : index
    %125 = memref.load %arg2[%c2_56] : memref<3xf32, #tpu.memory_space<smem>>
    %126 = vector.broadcast %125 : f32 to vector<1x32x128xf32>
    %127 = arith.addf %124, %126 : vector<1x32x128xf32>
    %128 = vector.shape_cast %127 : vector<1x32x128xf32> to vector<1x1x32x128xf32>
    %cst_57 = arith.constant dense<0.000000e+00> : vector<1xf32>
    %129 = vector.multi_reduction <add>, %128, %cst_57 [1, 2, 3] : vector<1x1x32x128xf32> to vector<1xf32>
    %130 = vector.shape_cast %129 : vector<1xf32> to vector<1x1x1x1xf32>
    %131 = vector.extract %130[0, 0, 0, 0] : f32 from vector<1x1x1x1xf32>
    %132 = vector.broadcast %131 : f32 to vector<1x1x1xf32>
    %133 = arith.mulf %127, %127 : vector<1x32x128xf32>
    %134 = vector.shape_cast %133 : vector<1x32x128xf32> to vector<1x1x32x128xf32>
    %cst_58 = arith.constant dense<0.000000e+00> : vector<1xf32>
    %135 = vector.multi_reduction <add>, %134, %cst_58 [1, 2, 3] : vector<1x1x32x128xf32> to vector<1xf32>
    %136 = vector.shape_cast %135 : vector<1xf32> to vector<1x1x1x1xf32>
    %137 = vector.extract %136[0, 0, 0, 0] : f32 from vector<1x1x1x1xf32>
    %138 = vector.broadcast %137 : f32 to vector<1x1x1xf32>
    %cst_59 = arith.constant 2.44140625E-4 : f32
    %139 = vector.broadcast %cst_59 : f32 to vector<1x1x1xf32>
    %140 = arith.mulf %132, %139 : vector<1x1x1xf32>
    %cst_60 = arith.constant 2.44140625E-4 : f32
    %141 = vector.broadcast %cst_60 : f32 to vector<1x1x1xf32>
    %142 = arith.mulf %138, %141 : vector<1x1x1xf32>
    %143 = arith.mulf %140, %140 : vector<1x1x1xf32>
    %144 = arith.subf %142, %143 : vector<1x1x1xf32>
    %cst_61 = arith.constant 0.000000e+00 : f32
    %145 = vector.broadcast %cst_61 : f32 to vector<1x1x1xf32>
    %146 = arith.maximumf %144, %145 : vector<1x1x1xf32>
    %cst_62 = arith.constant 9.99999974E-6 : f32
    %147 = vector.broadcast %cst_62 : f32 to vector<1x1x1xf32>
    %148 = arith.addf %146, %147 : vector<1x1x1xf32>
    %149 = math.rsqrt %148 : vector<1x1x1xf32>
    %c2_63 = arith.constant 2 : index
    %150 = memref.load %arg3[%c2_63] : memref<3xf32, #tpu.memory_space<smem>>
    %151 = vector.broadcast %150 : f32 to vector<1x1x1xf32>
    %152 = arith.mulf %151, %149 : vector<1x1x1xf32>
    %c2_64 = arith.constant 2 : index
    %153 = memref.load %arg4[%c2_64] : memref<3xf32, #tpu.memory_space<smem>>
    %154 = arith.mulf %140, %152 : vector<1x1x1xf32>
    %155 = vector.broadcast %153 : f32 to vector<1x1x1xf32>
    %156 = arith.subf %155, %154 : vector<1x1x1xf32>
    %cst_65 = arith.constant 5.000000e-01 : f32
    %157 = vector.broadcast %cst_65 : f32 to vector<1x1x1xf32>
    %158 = arith.subf %156, %157 : vector<1x1x1xf32>
    %159 = vector.broadcast %152 : vector<1x1x1xf32> to vector<1x32x128xf32>
    %160 = arith.mulf %127, %159 : vector<1x32x128xf32>
    %161 = vector.broadcast %158 : vector<1x1x1xf32> to vector<1x32x128xf32>
    %162 = arith.addf %160, %161 : vector<1x32x128xf32>
    %cst_66 = arith.constant 0.000000e+00 : f32
    %163 = vector.broadcast %cst_66 : f32 to vector<1x32x128xf32>
    %164 = arith.maximumf %162, %163 : vector<1x32x128xf32>
    %c0_67 = arith.constant 0 : index
    %c2_68 = arith.constant 2 : index
    %c0_69 = arith.constant 0 : index
    %c0_70 = arith.constant 0 : index
    %165 = vector.load %arg6[%c0_67, %c2_68, %c0_69, %c0_70] : memref<1x3x32x128xf32, #tpu.memory_space<vmem>>, vector<1x1x32x128xf32>
    %166 = vector.shape_cast %165 : vector<1x1x32x128xf32> to vector<1x32x128xf32>
    %167 = vector.shape_cast %164 : vector<1x32x128xf32> to vector<1x1x32x128xf32>
    tpu.vector_store %arg6[%c0_67, %c2_68, %c0_69, %c0_70], %167 {strides = array<i32>} : memref<1x3x32x128xf32, #tpu.memory_space<vmem>>, vector<1x1x32x128xf32>,
    return
  }
  func.func @transform_0(%arg0: i32) -> (i32, i32) {
    %c0_i32 = arith.constant 0 : i32
    %c0_i32_0 = arith.constant 0 : i32
    %c0_i32_1 = arith.constant 0 : i32
    return %c0_i32, %c0_i32_0 : i32, i32
  }
  func.func @transform_1(%arg0: i32) -> i32 {
    %c0_i32 = arith.constant 0 : i32
    %c0_i32_0 = arith.constant 0 : i32
    return %c0_i32 : i32
  }
  func.func @transform_2(%arg0: i32) -> i32 {
    %c0_i32 = arith.constant 0 : i32
    %c0_i32_0 = arith.constant 0 : i32
    return %c0_i32 : i32
  }
  func.func @transform_3(%arg0: i32) -> i32 {
    %c0_i32 = arith.constant 0 : i32
    %c0_i32_0 = arith.constant 0 : i32
    return %c0_i32 : i32
  }
  func.func @transform_4(%arg0: i32) -> (i32, i32, i32, i32) {
    %c0_i32 = arith.constant 0 : i32
    %c0_i32_0 = arith.constant 0 : i32
    %c0_i32_1 = arith.constant 0 : i32
    %c0_i32_2 = arith.constant 0 : i32
    %c0_i32_3 = arith.constant 0 : i32
    return %c0_i32, %c0_i32_0, %c0_i32_1, %c0_i32_2 : i32, i32, i32, i32
  }
  func.func @transform_5(%arg0: i32) -> (i32, i32, i32, i32) {
    %c0_i32 = arith.constant 0 : i32
    %c0_i32_0 = arith.constant 0 : i32
    %c0_i32_1 = arith.constant 0 : i32
    %c0_i32_2 = arith.constant 0 : i32
    %c0_i32_3 = arith.constant 0 : i32
    return %c0_i32, %c0_i32_0, %c0_i32_1, %c0_i32_2 : i32, i32, i32, i32
  }
}

</mosaic_0001>

<bundles_post_ra>
// kernel: fused_conv_bn_relu.1
= control target key start
LH: loop header
LB: loop body
LE: loop exit
PB: predicated region body
PF: predicated region fallthrough
CT: control target
= control target key end

     0   :  { %10 = vsyncpa [#allocation3], 0  ;;  %s762_s0 = inlined_call_operand.vmem [shape: f32[3,3], index: 0, kind: input, shape index: {}]   ;;  %s763_s1 = inlined_call_operand.vmem [shape: f32[3], index: 1, kind: input, shape index: {}]   ;;  %s764_s2 = inlined_call_operand.vmem [shape: f32[3], index: 2, kind: input, shape index: {}]   ;;  %s765_s3 = inlined_call_operand.vmem [shape: f32[3], index: 3, kind: input, shape index: {}]   ;;  %s766_s4 = inlined_call_operand.vmem [shape: f32[1,3,32,128], index: 4, kind: input, shape index: {}]   ;;  %s767_s5 = inlined_call_operand.vmem [shape: f32[1,3,32,128], index: 5, kind: output, shape index: {}]  }
   0x1   :  { %11 = vsyncpa [#allocation5], 0  ;;  %s29_s20 = sshll.u32 %s763_s1, 4  ;;  %s30_s20 = int_to_ptr.vmem [resolvable:$true] %s29_s20 }
   0x2   :  { %12 = vsyncpa [#allocation8], 0  ;;  %s19_s23 = sshll.u32 %s762_s0, 4  ;;  %s425_s24 = scalar_lea.vmem %s30_s20, 16  ;;  %s20_s23 = int_to_ptr.vmem [resolvable:$true] %s19_s23 }
   0x3   :  { %p426_p0 = scmp.ne.s32.totalorder %s30_s20, %s425_s24  ;;  %p430_p1 = scmp.lt.s32.totalorder %s30_s20, %s30_s20 }
   0x4   :  { %p431_p2 = scmp.lt.s32.totalorder %s425_s24, %s425_s24 }
   0x6   :  { %p432_p3 = por %p431_p2, %p430_p1 }
   0x8   :  { %p433_p4 = pnand %p432_p3, %p426_p0 }
   0xa   :  { %436 = shalt.err (!%p433_p4)
}
   0xb   :  { %s479_s25 = smov [#allocation4]   ;;  %s437_s26 = scalar_lea.vmem %s20_s23, 64 }
   0xc   :  { %32 = dma.vmem_to_smem %s30_s20, 16, %s479_s25, [#allocation5]  }
   0xd   :  { %p438_p5 = scmp.ne.s32.totalorder %s20_s23, %s437_s26  ;;  %p442_p6 = scmp.lt.s32.totalorder %s20_s23, %s20_s23 }
   0xe   :  { %p443_p7 = scmp.lt.s32.totalorder %s437_s26, %s437_s26 }
  0x10   :  { %p444_p8 = por %p443_p7, %p442_p6 }
  0x12   :  { %p445_p9 = pnand %p444_p8, %p438_p5 }
  0x14   :  { %448 = shalt.err (!%p445_p9)
}
  0x15   :  { %s480_s1 = smov [#allocation2]   ;;  %s39_s28 = sshll.u32 %s764_s2, 4  ;;  %s40_s28 = int_to_ptr.vmem [resolvable:$true] %s39_s28 }
  0x16   :  { %22 = dma.vmem_to_smem %s20_s23, 64, %s480_s1, [#allocation3]  }
  0x17   :  { %s49_s6 = sshll.u32 %s765_s3, 4  ;;  %s449_s7 = scalar_lea.vmem %s40_s28, 16  ;;  %s50_s6 = int_to_ptr.vmem [resolvable:$true] %s49_s6 }
  0x18   :  { %p450_p10 = scmp.ne.s32.totalorder %s40_s28, %s449_s7  ;;  %p454_p11 = scmp.lt.s32.totalorder %s40_s28, %s40_s28 }
  0x19   :  { %p455_p12 = scmp.lt.s32.totalorder %s449_s7, %s449_s7 }
  0x1b   :  { %p456_p13 = por %p455_p12, %p454_p11 }
  0x1d   :  { %p457_p0 = pnand %p456_p13, %p450_p10 }
  0x1f   :  { %460 = shalt.err (!%p457_p0)
}
  0x20   :  { %s481_s8 = smov [#allocation6]   ;;  %s461_s9 = scalar_lea.vmem %s50_s6, 16 }
  0x21   :  { %42 = dma.vmem_to_smem %s40_s28, 16, %s481_s8, [#allocation5]  }
  0x22   :  { %p462_p1 = scmp.ne.s32.totalorder %s50_s6, %s461_s9  ;;  %p466_p2 = scmp.lt.s32.totalorder %s50_s6, %s50_s6 }
  0x23   :  { %p467_p3 = scmp.lt.s32.totalorder %s461_s9, %s461_s9 }
  0x25   :  { %p468_p4 = por %p467_p3, %p466_p2 }
  0x27   :  { %p469_p5 = pnand %p468_p4, %p462_p1 }
  0x29   :  { %472 = shalt.err (!%p469_p5)
}
  0x2a   :  { %s482_s2 = smov [#allocation7]  }
  0x2b   :  { %52 = dma.vmem_to_smem %s50_s6, 16, %s482_s2, [#allocation8]  }
  0x2c   :  { %473 = dma.done.wait [#allocation3], 64  }
  0x2d   :  { %474 = vsyncadd [#allocation3], 4294967232 }
  0x2e   :  { %475 = dma.done.wait [#allocation5], 32  }
  0x2f   :  { %476 = vsyncadd [#allocation5], 4294967264 }
  0x30   :  { %477 = dma.done.wait [#allocation8], 16  }
  0x31   :  { %478 = vsyncadd [#allocation8], 4294967280 }
  0x32   :  { %67 = sfence }
  0x33   :  { %s381_s3 = sld [smem:[#allocation2 + $0x80]]  ;;  %s382_s10 = sld [smem:[#allocation2 + $0x81]]  ;;  %v528_v0 = vld [vmem:[%s766_s4] sm:$0xff]  ;;  %v533_v1 = vld [vmem:[%s766_s4 + $0x8] sm:$0xff]  ;;  %v540_v2 = vld [vmem:[%s766_s4 + $0x10] sm:$0xff] }
  0x34   :  { %s383_s11 = sld [smem:[#allocation2 + $0x82]]  ;;  %s535_s16 = sld [smem:[#allocation4 + $0x1]]  ;;  %v545_v3 = vld [vmem:[%s766_s4 + $0x18] sm:$0xff]  ;;  %v554_v4 = vld [vmem:[%s766_s4 + $0x20] sm:$0xff]  ;;  %v559_v5 = vld [vmem:[%s766_s4 + $0x28] sm:$0xff] }
  0x35   :  { %s547_s21 = sld [smem:[#allocation2]]  ;;  %s549_s22 = sld [smem:[#allocation2 + $0x1]]  ;;  %v566_v6 = vld [vmem:[%s766_s4 + $0x30] sm:$0xff]  ;;  %v571_v7 = vld [vmem:[%s766_s4 + $0x38] sm:$0xff]  ;;  %v576_v8 = vld [vmem:[%s766_s4 + $0x40] sm:$0xff] }
  0x36   :  { %s561_s1 = sld [smem:[#allocation2 + $0x2]]  ;;  %v581_v10 = vld [vmem:[%s766_s4 + $0x48] sm:$0xff]  ;;  %v586_v11 = vld [vmem:[%s766_s4 + $0x50] sm:$0xff]  ;;  %v591_v12 = vld [vmem:[%s766_s4 + $0x58] sm:$0xff]  ;;  %s605_s4 = sld [smem:[#allocation4]] }
  0x37   :  { %s661_s14 = sld [smem:[#allocation4 + $0x2]]  ;;  %s154_s23 = sld [smem:[#allocation7]] }
  0x38   :  { %s386_s24 = sld [smem:[#allocation7 + $0x1]]  ;;  %s708_s25 = sld [smem:[#allocation6 + $0x2]] }
  0x39   :  { %v176_v9 = vstv %s381_s3  ;;  %v182_v17 = vstv %s382_s10  ;;  %s615_s3 = sld [smem:[#allocation2 + $0x100]]  ;;  %s625_s10 = sld [smem:[#allocation2 + $0x101]] }
  0x3a   :  { %v177_v13 = vmul.f32 %v176_v9, %v528_v0  ;;  %v178_v14 = vmul.f32 %v176_v9, %v533_v1  ;;  %v179_v15 = vmul.f32 %v176_v9, %v540_v2  ;;  %v180_v16 = vmul.f32 %v176_v9, %v545_v3  ;;  %s710_s26 = sld [smem:[#allocation7 + $0x2]] }
  0x3b   :  { %v192_v18 = vstv %s383_s11  ;;  %v183_v19 = vmul.f32 %v554_v4, %v182_v17  ;;  %v184_v20 = vmul.f32 %v559_v5, %v182_v17  ;;  %v185_v21 = vmul.f32 %v566_v6, %v182_v17  ;;  %s627_s11 = sld [smem:[#allocation2 + $0x102]] }
  0x3c   :  { %v186_v22 = vmul.f32 %v571_v7, %v182_v17  ;;  %v193_v23 = vmul.f32 %v576_v8, %v192_v18  ;;  %v194_v24 = vmul.f32 %v581_v10, %v192_v18  ;;  %v195_v25 = vmul.f32 %v586_v11, %v192_v18 }
  0x3d   :  { %v196_v26 = vmul.f32 %v591_v12, %v192_v18  ;;  %v187_v27 = vadd.f32 %v183_v19, %v177_v13  ;;  %v188_v28 = vadd.f32 %v184_v20, %v178_v14  ;;  %v189_v29 = vadd.f32 %v185_v21, %v179_v15 }
  0x3e   :  { %v190_v30 = vadd.f32 %v186_v22, %v180_v16  ;;  %v202_v31 = vstv %s535_s16  ;;  %v83_v32 = vstv %s547_s21  ;;  %v89_v33 = vstv %s549_s22  ;;  %s151_s21 = sld [smem:[#allocation6]]  ;;  %s385_s22 = sld [smem:[#allocation6 + $0x1]] }
  0x3f   :  { %v99_v34 = vstv %s561_s1  ;;  %v197_v35 = vadd.f32 %v193_v23, %v187_v27  ;;  %v198_v36 = vadd.f32 %v194_v24, %v188_v28  ;;  %v199_v37 = vadd.f32 %v195_v25, %v189_v29 }
  0x40   :  { %v200_v38 = vadd.f32 %v196_v26, %v190_v30  ;;  %v84_v39 = vmul.f32 %v83_v32, %v528_v0  ;;  %v85_v40 = vmul.f32 %v83_v32, %v533_v1  ;;  %v86_v41 = vmul.f32 %v83_v32, %v540_v2 }
  0x41   :  { %v87_v42 = vmul.f32 %v83_v32, %v545_v3  ;;  %v617_v43 = vadd.f32 %v202_v31, %v197_v35  ;;  %v619_v44 = vadd.f32 %v202_v31, %v198_v36  ;;  %v621_v45 = vadd.f32 %v202_v31, %v199_v37 }
  0x42   :  { %v623_v46 = vadd.f32 %v202_v31, %v200_v38  ;;  %v90_v47 = vmul.f32 %v554_v4, %v89_v33  ;;  %v91_v48 = vmul.f32 %v559_v5, %v89_v33  ;;  %v92_v49 = vmul.f32 %v566_v6, %v89_v33 }
  0x43   :  { %v93_v50 = vmul.f32 %v571_v7, %v89_v33  ;;  %v207_v51 = vadd.f32 %v619_v44, %v617_v43  ;;  %v100_v52 = vmul.f32 %v576_v8, %v99_v34  ;;  %v101_v53 = vmul.f32 %v581_v10, %v99_v34 }
  0x44   :  { %v102_v54 = vmul.f32 %v586_v11, %v99_v34  ;;  %v94_v55 = vadd.f32 %v90_v47, %v84_v39  ;;  %v95_v56 = vadd.f32 %v91_v48, %v85_v40  ;;  %v96_v57 = vadd.f32 %v92_v49, %v86_v41 }
  0x45   :  { %v97_v58 = vadd.f32 %v93_v50, %v87_v42  ;;  %v208_v59 = vadd.f32 %v207_v51, %v621_v45  ;;  %v103_v60 = vmul.f32 %v591_v12, %v99_v34  ;;  %v109_v61 = vstv %s605_s4 }
  0x46   :  { %v220_v62 = vmul.f32 %v617_v43, %v617_v43  ;;  %v104_v63 = vadd.f32 %v100_v52, %v94_v55  ;;  %v105_v9 = vadd.f32 %v101_v53, %v95_v56  ;;  %v106_v13 = vadd.f32 %v102_v54, %v96_v57 }
  0x47   :  { %v221_v14 = vmul.f32 %v619_v44, %v619_v44  ;;  %v209_v15 = vadd.f32 %v208_v59, %v623_v46  ;;  %v107_v16 = vadd.f32 %v103_v60, %v97_v58  ;;  %v222_v17 = vmul.f32 %v621_v45, %v621_v45 }
  0x48   :  { %v223_v18 = vmul.f32 %v623_v46, %v623_v46  ;;  %v650_v19 = vadd.f32 %v109_v61, %v104_v63  ;;  %v652_v20 = vadd.f32 %v109_v61, %v105_v9  ;;  %v654_v21 = vadd.f32 %v109_v61, %v106_v13 }
  0x49   :  { %v224_v22 = vadd.f32 %v221_v14, %v220_v62  ;;  %210 = vadd.xlane.f32.xlu1 %v209_v15  ;;  %v656_v23 = vadd.f32 %v109_v61, %v107_v16  ;;  %v270_v24 = vstv %s615_s3  ;;  %v276_v25 = vstv %s625_s10 }
  0x4a   :  { %v286_v26 = vstv %s627_s11  ;;  %v114_v27 = vadd.f32 %v652_v20, %v650_v19  ;;  %v127_v29 = vmul.f32 %v650_v19, %v650_v19  ;;  %v128_v30 = vmul.f32 %v652_v20, %v652_v20 }
  0x4b   :  { %v225_v28 = vadd.f32 %v224_v22, %v222_v17  ;;  %v129_v31 = vmul.f32 %v654_v21, %v654_v21  ;;  %v130_v32 = vmul.f32 %v656_v23, %v656_v23  ;;  %v271_v33 = vmul.f32 %v270_v24, %v528_v0 }
  0x4c   :  { %v272_v34 = vmul.f32 %v270_v24, %v533_v1  ;;  %v115_v35 = vadd.f32 %v114_v27, %v654_v21  ;;  %v131_v37 = vadd.f32 %v128_v30, %v127_v29  ;;  %v273_v38 = vmul.f32 %v270_v24, %v540_v2 }
  0x4d   :  { %v226_v36 = vadd.f32 %v225_v28, %v223_v18  ;;  %v274_v39 = vmul.f32 %v270_v24, %v545_v3  ;;  %v277_v40 = vmul.f32 %v554_v4, %v276_v25  ;;  %v278_v41 = vmul.f32 %v559_v5, %v276_v25 }
  0x4e   :  { %v279_v42 = vmul.f32 %v566_v6, %v276_v25  ;;  %v116_v47 = vadd.f32 %v115_v35, %v656_v23  ;;  %v132_v0 = vadd.f32 %v131_v37, %v129_v31  ;;  %v280_v1 = vmul.f32 %v571_v7, %v276_v25 }
  0x4f   :  { %227 = vadd.xlane.f32.xlu1 %v226_v36  ;;  %v287_v48 = vmul.f32 %v576_v8, %v286_v26  ;;  %v281_v49 = vadd.f32 %v277_v40, %v271_v33  ;;  %v282_v50 = vadd.f32 %v278_v41, %v272_v34  ;;  %v288_v3 = vmul.f32 %v581_v10, %v286_v26 }
  0x50   :  { %v283_v2 = vadd.f32 %v279_v42, %v273_v38  ;;  %117 = vadd.xlane.f32.xlu0 %v116_v47  ;;  %v133_v4 = vadd.f32 %v132_v0, %v130_v32  ;;  %v284_v51 = vadd.f32 %v280_v1, %v274_v39  ;;  %v289_v5 = vmul.f32 %v586_v11, %v286_v26 }
  0x51   :  { %v290_v6 = vmul.f32 %v591_v12, %v286_v26  ;;  %v291_v52 = vadd.f32 %v287_v48, %v281_v49  ;;  %v292_v53 = vadd.f32 %v288_v3, %v282_v50  ;;  %v296_v54 = vstv %s661_s14 }
  0x52   :  { %v293_v55 = vadd.f32 %v289_v5, %v283_v2 }
  0x53   :  { %v294_v56 = vadd.f32 %v290_v6, %v284_v51  ;;  %v688_v7 = vadd.f32 %v296_v54, %v291_v52  ;;  %v690_v8 = vadd.f32 %v296_v54, %v292_v53 }
  0x54   :  { %134 = vadd.xlane.f32.xlu0 %v133_v4  ;;  %v692_v57 = vadd.f32 %v296_v54, %v293_v55 }
  0x55   :  { %v694_v10 = vadd.f32 %v296_v54, %v294_v56  ;;  %v314_v58 = vmul.f32 %v688_v7, %v688_v7  ;;  %v315_v11 = vmul.f32 %v690_v8, %v690_v8  ;;  %v301_v12 = vadd.f32 %v690_v8, %v688_v7 }
  0x56   :  { %v316_v59 = vmul.f32 %v692_v57, %v692_v57 }
  0x57   :  { %v317_v60 = vmul.f32 %v694_v10, %v694_v10  ;;  %v318_v61 = vadd.f32 %v315_v11, %v314_v58  ;;  %v302_v62 = vadd.f32 %v301_v12, %v692_v57 }
  0x59   :  { %v319_v63 = vadd.f32 %v318_v61, %v316_v59  ;;  %v303_v9 = vadd.f32 %v302_v62, %v694_v10 }
  0x5b   :  { %v320_v13 = vadd.f32 %v319_v63, %v317_v60  ;;  %304 = vadd.xlane.f32.xlu0 %v303_v9 }
  0x5d   :  { %321 = vadd.xlane.f32.xlu1 %v320_v13 }
  0xd6   :  { %v211_v14 = vpop.xlane.xlu1 %210 }
  0xd7   :  { %v212_v15 = vrot.slane %v211_v14, 4 }
  0xd9   :  { %v213_v18 = vadd.f32 %v212_v15, %v211_v14 }
  0xdb   :  { %v214_v28 = vrot.slane %v213_v18, 2 }
  0xdc   :  { %v228_v16 = vpop.xlane.xlu1 %227 }
  0xdd   :  { %v229_v17 = vrot.slane %v228_v16, 4  ;;  %v118_v22 = vpop.xlane.xlu0 %117  ;;  %v215_v35 = vadd.f32 %v214_v28, %v213_v18 }
  0xde   :  { %v119_v24 = vrot.slane %v118_v22, 4 }
  0xdf   :  { %v230_v25 = vadd.f32 %v229_v17, %v228_v16  ;;  %v216_v47 = vrot.slane %v215_v35, 1 }
  0xe0   :  { %v120_v26 = vadd.f32 %v119_v24, %v118_v22 }
  0xe1   :  { %v231_v27 = vrot.slane %v230_v25, 2  ;;  %v135_v29 = vpop.xlane.xlu0 %134  ;;  %v217_v51 = vadd.f32 %v216_v47, %v215_v35  ;;  %v245_v35 = vstv %s385_s22 }
  0xe2   :  { %v121_v30 = vrot.slane %v120_v26, 2  ;;  %v136_v31 = vrot.slane %v135_v29, 4 }
  0xe3   :  { %v232_v34 = vadd.f32 %v231_v27, %v230_v25 }
  0xe4   :  { %v137_v32 = vadd.f32 %v136_v31, %v135_v29  ;;  %v122_v33 = vadd.f32 %v121_v30, %v120_v26 }
  0xe5   :  { %v233_v41 = vrot.slane %v232_v34, 1 }
  0xe6   :  { %v138_v36 = vrot.slane %v137_v32, 2  ;;  %v123_v37 = vrot.slane %v122_v33, 1 }
  0xe7   :  { %v234_v2 = vadd.f32 %v233_v41, %v232_v34  ;;  %v249_v41 = vstv %s386_s24 }
  0xe8   :  { %v305_v38 = vpop.xlane.xlu0 %304  ;;  %v124_v39 = vadd.f32 %v123_v37, %v122_v33  ;;  %v139_v40 = vadd.f32 %v138_v36, %v137_v32  ;;  %v152_v32 = vstv %s151_s21  ;;  %v156_v36 = vstv %s154_s23 }
  0xe9   :  { %v306_v42 = vrot.slane %v305_v38, 4 }
  0xea   :  { %v322_v0 = vpop.xlane.xlu1 %321  ;;  %403 = vpush %v124_v39  ;;  %v140_v1 = vrot.slane %v139_v40, 1 }
  0xeb   :  { %v323_v48 = vrot.slane %v322_v0, 4  ;;  %v307_v49 = vadd.f32 %v306_v42, %v305_v38 }
  0xec   :  { %v141_v50 = vadd.f32 %v140_v1, %v139_v40 }
  0xed   :  { %v324_v3 = vadd.f32 %v323_v48, %v322_v0  ;;  %v308_v4 = vrot.slane %v307_v49, 2  ;;  %v339_v0 = vstv %s708_s25 }
  0xee   :  { %405 = vpush %v141_v50 }
  0xef   :  { %v325_v5 = vrot.slane %v324_v3, 2  ;;  %v309_v6 = vadd.f32 %v308_v4, %v307_v49  ;;  %407 = vpush %v217_v51  ;;  %v343_v51 = vstv %s710_s26 }
  0xf0   :  { %409 = vpush %v234_v2 }
  0xf1   :  { %v326_v52 = vadd.f32 %v325_v5, %v324_v3  ;;  %v310_v53 = vrot.slane %v309_v6, 1 }
  0xf3   :  { %v311_v54 = vadd.f32 %v310_v53, %v309_v6  ;;  %v327_v55 = vrot.slane %v326_v52, 1 }
  0xf5   :  { %411 = vpush %v311_v54  ;;  %v328_v56 = vadd.f32 %v327_v55, %v326_v52 }
  0xf7   :  { %413 = vpush %v328_v56 }
 0x11b   :  { %s404_s15 = spop %403 }
 0x11c   :  { %v126_v58 = vstv %s404_s15 }
 0x11d   :  { %v144_v11 = vmul.f32 0.00024414063, %v126_v58 }
 0x11f   :  { %s406_s16 = spop %405  ;;  %v146_v59 = vmul.f32 %v144_v11, %v144_v11 }
 0x120   :  { %v143_v12 = vstv %s406_s16  ;;  %s408_s17 = spop %407 }
 0x121   :  { %v145_v60 = vmul.f32 0.00024414063, %v143_v12  ;;  %v219_v61 = vstv %s408_s17  ;;  %s410_s18 = spop %409 }
 0x122   :  { %v237_v62 = vmul.f32 0.00024414063, %v219_v61  ;;  %v236_v63 = vstv %s410_s18 }
 0x123   :  { %v147_v9 = vsub.f32 %v145_v60, %v146_v59  ;;  %v238_v14 = vmul.f32 0.00024414063, %v236_v63 }
 0x124   :  { %v239_v13 = vmul.f32 %v237_v62, %v237_v62 }
 0x125   :  { %v148_v15 = vmax.f32 %v147_v9, 0.0 }
 0x126   :  { %v240_v16 = vsub.f32 %v238_v14, %v239_v13  ;;  %s412_s19 = spop %411 }
 0x127   :  { %v149_v17 = vadd.f32 1e-05, %v148_v15  ;;  %v313_v18 = vstv %s412_s19 }
 0x128   :  { %v241_v22 = vmax.f32 %v240_v16, 0.0  ;;  %v331_v24 = vmul.f32 0.00024414063, %v313_v18  ;;  %s414_s20 = spop %413 }
 0x129   :  { %419 = vrsqrt.f32 %v149_v17  ;;  %v330_v25 = vstv %s414_s20 }
 0x12a   :  { %v242_v26 = vadd.f32 1e-05, %v241_v22  ;;  %v333_v27 = vmul.f32 %v331_v24, %v331_v24  ;;  %v332_v28 = vmul.f32 0.00024414063, %v330_v25 }
 0x12c   :  { %421 = vrsqrt.f32 %v242_v26  ;;  %v334_v29 = vsub.f32 %v332_v28, %v333_v27 }
 0x12e   :  { %v335_v30 = vmax.f32 %v334_v29, 0.0 }
 0x130   :  { %v336_v31 = vadd.f32 1e-05, %v335_v30 }
 0x132   :  { %423 = vrsqrt.f32 %v336_v31 }
 0x133   :  { %v420_v33 = vpop.eup %419 }
 0x134   :  { %v153_v34 = vmul.f32 %v420_v33, %v152_v32 }
 0x136   :  { %v422_v37 = vpop.eup %421  ;;  %v155_v38 = vmul.f32 %v153_v34, %v144_v11  ;;  %v159_v42 = vmul.f32 %v153_v34, %v650_v19  ;;  %v160_v48 = vmul.f32 %v153_v34, %v652_v20  ;;  %v161_v49 = vmul.f32 %v153_v34, %v654_v21 }
 0x137   :  { %v246_v39 = vmul.f32 %v422_v37, %v245_v35  ;;  %v162_v50 = vmul.f32 %v153_v34, %v656_v23 }
 0x138   :  { %v157_v40 = vsub.f32 %v156_v36, %v155_v38 }
 0x139   :  { %v248_v47 = vmul.f32 %v246_v39, %v237_v62  ;;  %v252_v3 = vmul.f32 %v246_v39, %v617_v43  ;;  %v253_v4 = vmul.f32 %v246_v39, %v619_v44  ;;  %v254_v55 = vmul.f32 %v246_v39, %v621_v45 }
 0x13a   :  { %v380_v1 = vadd.f32 -0.5, %v157_v40  ;;  %v255_v20 = vmul.f32 %v246_v39, %v623_v46 }
 0x13b   :  { %v250_v2 = vsub.f32 %v249_v41, %v248_v47 }
 0x13c   :  { %v424_v5 = vpop.eup %423  ;;  %v163_v6 = vadd.f32 %v380_v1, %v159_v42  ;;  %v164_v52 = vadd.f32 %v380_v1, %v160_v48  ;;  %v165_v53 = vadd.f32 %v380_v1, %v161_v49  ;;  %v166_v19 = vadd.f32 %v380_v1, %v162_v50 }
 0x13d   :  { %v387_v54 = vadd.f32 -0.5, %v250_v2  ;;  %v340_v56 = vmul.f32 %v424_v5, %v339_v0 }
 0x13e   :  { %v167_v21 = vmax.f32 %v163_v6, 0.0  ;;  %v168_v58 = vmax.f32 %v164_v52, 0.0  ;;  %v169_v23 = vmax.f32 %v165_v53, 0.0  ;;  %v170_v11 = vmax.f32 %v166_v19, 0.0 }
 0x13f   :  { %v256_v12 = vadd.f32 %v387_v54, %v252_v3  ;;  %v257_v43 = vadd.f32 %v387_v54, %v253_v4  ;;  %v258_v59 = vadd.f32 %v387_v54, %v254_v55  ;;  %v259_v44 = vadd.f32 %v387_v54, %v255_v20 }
 0x140   :  { %171 = vst [vmem:[%s767_s5] sm:$0xff] %v167_v21  ;;  %172 = vst [vmem:[%s767_s5 + $0x8] sm:$0xff] %v168_v58  ;;  %v342_v45 = vmul.f32 %v340_v56, %v331_v24  ;;  %v346_v9 = vmul.f32 %v340_v56, %v688_v7  ;;  %v347_v14 = vmul.f32 %v340_v56, %v690_v8 }
 0x141   :  { %173 = vst [vmem:[%s767_s5 + $0x10] sm:$0xff] %v169_v23  ;;  %174 = vst [vmem:[%s767_s5 + $0x18] sm:$0xff] %v170_v11  ;;  %v260_v46 = vmax.f32 %v256_v12, 0.0  ;;  %v261_v60 = vmax.f32 %v257_v43, 0.0  ;;  %v262_v61 = vmax.f32 %v258_v59, 0.0  ;;  %v263_v62 = vmax.f32 %v259_v44, 0.0 }
 0x142   :  { %v344_v63 = vsub.f32 %v343_v51, %v342_v45  ;;  %v348_v15 = vmul.f32 %v340_v56, %v692_v57  ;;  %v349_v16 = vmul.f32 %v340_v56, %v694_v10 }
 0x143   :  { %388 = vst [vmem:[%s767_s5 + $0x20] sm:$0xff] %v260_v46  ;;  %389 = vst [vmem:[%s767_s5 + $0x28] sm:$0xff] %v261_v60 }
 0x144   :  { %390 = vst [vmem:[%s767_s5 + $0x30] sm:$0xff] %v262_v61  ;;  %391 = vst [vmem:[%s767_s5 + $0x38] sm:$0xff] %v263_v62  ;;  %v398_v13 = vadd.f32 -0.5, %v344_v63 }
 0x146   :  { %v350_v17 = vadd.f32 %v398_v13, %v346_v9  ;;  %v351_v18 = vadd.f32 %v398_v13, %v347_v14  ;;  %v352_v22 = vadd.f32 %v398_v13, %v348_v15  ;;  %v353_v24 = vadd.f32 %v398_v13, %v349_v16 }
 0x148   :  { %v354_v25 = vmax.f32 %v350_v17, 0.0  ;;  %v355_v26 = vmax.f32 %v351_v18, 0.0  ;;  %v356_v27 = vmax.f32 %v352_v22, 0.0  ;;  %v357_v28 = vmax.f32 %v353_v24, 0.0 }
 0x14a   :  { %399 = vst [vmem:[%s767_s5 + $0x40] sm:$0xff] %v354_v25  ;;  %400 = vst [vmem:[%s767_s5 + $0x48] sm:$0xff] %v355_v26 }
 0x14b   :  { %401 = vst [vmem:[%s767_s5 + $0x50] sm:$0xff] %v356_v27  ;;  %402 = vst [vmem:[%s767_s5 + $0x58] sm:$0xff] %v357_v28 }
 0x14c   :  { %367 = vsyncpa [#allocation3], 1 }
 0x14d   :  { %368 = vsyncpa [#allocation5], 1 }
 0x14e   :  { %369 = vsyncpa [#allocation8], 1 }

</bundles_post_ra>
